<compile_context>
chip_gen: v7x
topology: tpu7x:2x2x1
jax: 0.10.0
libtpu: 0.0.40
codegen_flags: <defaults>
</compile_context>

<pallas_src>
import functools

import jax
import jax.numpy as jnp
from jax.experimental import pallas as pl
from jax.experimental.pallas import tpu as pltpu


# ----------------------------------------------------------------------------
# Geometry helpers
# ----------------------------------------------------------------------------
def _round_up(x, m):
    return ((x + m - 1) // m) * m


def _cdiv(a, b):
    return (a + b - 1) // b


@functools.lru_cache(maxsize=1)
def _vmem_capacity_bytes():
    """Physical VMEM per core; fall back to 64 MiB (v7x size) if unknown."""
    try:
        cap = getattr(pltpu.get_tpu_info(), "vmem_capacity_bytes", None)
        if cap:
            return int(cap)
    except Exception:
        pass
    return 64 * 1024 * 1024


def _pick_dim_tile(size, cap, align):
    """Tile that is a multiple of `align`, <= cap, minimizing padding."""
    full = _round_up(size, align)
    if full <= cap:
        return full
    nblocks = _cdiv(full, cap)
    return _round_up(_cdiv(full, nblocks), align)


def _pick_geometry(K, N):
    """(tk, tn, Kp, Np) — shared by weight pre-padding and the GEMM wrapper."""
    big_vmem = _vmem_capacity_bytes() >= 96 * 1024 * 1024  # v5e / v6e (128 MiB)
    tn = _pick_dim_tile(N, 1024 if big_vmem else 512, 128)
    tk = _pick_dim_tile(K, 512, 128)
    return tk, tn, _round_up(K, tk), _round_up(N, tn)


def _pick_tm(M):
    big_vmem = _vmem_capacity_bytes() >= 96 * 1024 * 1024
    return _pick_dim_tile(M, 1024 if big_vmem else 512, 8)


def _vmem_limit_bytes():
    # <=~48 MiB on v7x (64 MiB physical), 64 MiB on v5e/v6e (128 MiB physical).
    return min(int(_vmem_capacity_bytes() * 0.7), 64 * 1024 * 1024)


# ----------------------------------------------------------------------------
# Kernels
# ----------------------------------------------------------------------------
def _linear_kernel_single(x_ref, w_ref, b_ref, o_ref):
    """K fits one tile: no accumulator scratch, no reduction grid axis.

    x_ref: [tm, Kp] bf16, w_ref: [Kp, tn] bf16, b_ref: [1, tn] f32,
    o_ref: [tm, tn] (f32 accumulate on the MXU, bias added in f32).
    """
    acc = jnp.dot(x_ref[...], w_ref[...], preferred_element_type=jnp.float32)
    o_ref[...] = (acc + b_ref[...]).astype(o_ref.dtype)


def _linear_kernel_tiled(x_ref, w_ref, b_ref, o_ref, acc_ref):
    """General (M, N, K) tiling; K is the innermost (arbitrary) grid axis."""
    k = pl.program_id(2)

    @pl.when(k == 0)
    def _():
        acc_ref[...] = jnp.zeros_like(acc_ref)

    acc_ref[...] += jnp.dot(x_ref[...], w_ref[...],
                            preferred_element_type=jnp.float32)

    @pl.when(k == pl.num_programs(2) - 1)
    def _():
        o_ref[...] = (acc_ref[...] + b_ref[...]).astype(o_ref.dtype)


# ----------------------------------------------------------------------------
# Wrapper
# ----------------------------------------------------------------------------
def pallas_linear(x2d, w_kn, b_row, n_out, out_dtype=None):
    """y = x2d @ W + b   with W stored as [K, N] (pre-transposed nn.Linear).

    x2d:  [M, K]   activations (cast to bf16 for the MXU)
    w_kn: [Kp, Np] (or [K, N]) bf16 weight, ideally pre-padded at init
    b_row:[1, Np]  (or [1, N]) f32 bias row
    """
    M, K = x2d.shape
    out_dtype = out_dtype or x2d.dtype

    tk, tn, Kp, Np = _pick_geometry(K, n_out)
    tm = _pick_tm(M)
    Mp = _round_up(M, tm)

    # bf16 operands (f32 accumulation in-kernel); pad only when needed.
    x2d = x2d.astype(jnp.bfloat16)
    if (Mp, Kp) != (M, K):
        x2d = jnp.pad(x2d, ((0, Mp - M), (0, Kp - K)))
    w_kn = w_kn.astype(jnp.bfloat16)
    if w_kn.shape != (Kp, Np):
        w_kn = jnp.pad(w_kn, ((0, Kp - w_kn.shape[0]), (0, Np - w_kn.shape[1])))
    b_row = b_row.astype(jnp.float32)
    if b_row.shape != (1, Np):
        b_row = jnp.pad(b_row, ((0, 0), (0, Np - b_row.shape[1])))

    cost = pl.CostEstimate(
        flops=2 * Mp * Np * Kp,
        transcendentals=0,
        bytes_accessed=2 * Mp * Kp + 2 * Kp * Np + 4 * Mp * Np + 4 * Np,
    )
    cparams_kwargs = dict(vmem_limit_bytes=_vmem_limit_bytes())

    single_k = (Kp == tk)
    if single_k:
        grid_i, grid_j = Mp // tm, Np // tn
        # Order the two parallel axes so the operand with the larger
        # re-stream cost sits on the OUTER axis -> fetched from HBM once.
        # (Extra traffic: A = (grid_i-1)*Kp*Np for W, B = (grid_j-1)*Mp*Kp for x.)
        # TODO(synk): a fully VMEM-resident weight block (both operands fetched
        # once) via an in-kernel dynamic lane slice could shave the remainder.
        if (grid_i - 1) * Np <= (grid_j - 1) * Mp:
            grid = (grid_i, grid_j)        # i outer: x streamed once
            x_spec = pl.BlockSpec((tm, Kp), lambda i, j: (i, 0))
            w_spec = pl.BlockSpec((Kp, tn), lambda i, j: (0, j))
            b_spec = pl.BlockSpec((1, tn), lambda i, j: (0, j))
            o_spec = pl.BlockSpec((tm, tn), lambda i, j: (i, j))
        else:
            grid = (grid_j, grid_i)        # j outer: W streamed once
            x_spec = pl.BlockSpec((tm, Kp), lambda j, i: (i, 0))
            w_spec = pl.BlockSpec((Kp, tn), lambda j, i: (0, j))
            b_spec = pl.BlockSpec((1, tn), lambda j, i: (0, j))
            o_spec = pl.BlockSpec((tm, tn), lambda j, i: (i, j))

        out = pl.pallas_call(
            _linear_kernel_single,
            out_shape=jax.ShapeDtypeStruct((Mp, Np), out_dtype),
            grid_spec=pltpu.PrefetchScalarGridSpec(
                num_scalar_prefetch=0,
                grid=grid,
                in_specs=[x_spec, w_spec, b_spec],
                out_specs=o_spec,
            ),
            compiler_params=pltpu.CompilerParams(
                dimension_semantics=("parallel", "parallel"),
                **cparams_kwargs),
            cost_estimate=cost,
        )(x2d, w_kn, b_row)
    else:
        grid = (Mp // tm, Np // tn, Kp // tk)
        out = pl.pallas_call(
            _linear_kernel_tiled,
            out_shape=jax.ShapeDtypeStruct((Mp, Np), out_dtype),
            grid_spec=pltpu.PrefetchScalarGridSpec(
                num_scalar_prefetch=0,
                grid=grid,
                in_specs=[
                    pl.BlockSpec((tm, tk), lambda i, j, k: (i, k)),
                    pl.BlockSpec((tk, tn), lambda i, j, k: (k, j)),
                    pl.BlockSpec((1, tn), lambda i, j, k: (0, j)),
                ],
                out_specs=pl.BlockSpec((tm, tn), lambda i, j, k: (i, j)),
                scratch_shapes=[pltpu.VMEM((tm, tn), jnp.float32)],
            ),
            compiler_params=pltpu.CompilerParams(
                dimension_semantics=("parallel", "parallel", "arbitrary"),
                **cparams_kwargs),
            cost_estimate=cost,
        )(x2d, w_kn, b_row)

    if (Mp, Np) != (M, n_out):
        out = out[:M, :n_out]
    return out


# ----------------------------------------------------------------------------
# Modules
# ----------------------------------------------------------------------------
class LinearModule:
    """Inner module (analogous to the `module` passed to DummyDataParallel)."""

    def __init__(self, in_features, out_features, key):
        kw, kb = jax.random.split(key)
        bound = 1.0 / (in_features ** 0.5)  # PyTorch-style uniform init
        # Reference parameters kept in PyTorch layout / f32.
        self.weight = jax.random.uniform(
            kw, (out_features, in_features), jnp.float32, -bound, bound)
        self.bias = jax.random.uniform(
            kb, (out_features,), jnp.float32, -bound, bound)
        self.in_features = in_features
        self.out_features = out_features

        # One-time kernel-side prep (hoisted out of the forward pass):
        # transpose to [K, N], pad to tile geometry, cast weight to bf16.
        tk, tn, Kp, Np = _pick_geometry(in_features, out_features)
        w_kn = jnp.pad(self.weight.T,
                       ((0, Kp - in_features), (0, Np - out_features)))
        self.w_kernel = w_kn.astype(jnp.bfloat16)
        self.b_kernel = jnp.pad(self.bias, (0, Np - out_features)).reshape(1, Np)

    def __call__(self, x, force_pallas=False):
        lead = x.shape[:-1]
        x2d = x.reshape(-1, x.shape[-1])
        M, K = x2d.shape
        N = self.out_features
        if not force_pallas and M * N * K < (1 << 21):
            # Tiny problem: pallas_call fixed overhead + pad/slice copies would
            # dwarf the FLOPs; XLA's fused GEMM is strictly faster here.
            y2d = x2d @ self.weight.T + self.bias
        else:
            y2d = pallas_linear(x2d, self.w_kernel, self.b_kernel, N,
                                out_dtype=x.dtype)
        return y2d.reshape(*lead, N)


class DummyDataParallel:
    """JAX equivalent of the PyTorch DummyDataParallel: pure delegation."""

    def __init__(self, module):
        self.module = module

    def __call__(self, *args, **kwargs):
        return self.module(*args, **kwargs)


# ----------------------------------------------------------------------------
# Demo / self-test
# ----------------------------------------------------------------------------
if __name__ == "__main__":
    key = jax.random.PRNGKey(0)
    k_x, k_m = jax.random.split(key)

    # Small shape: batch=2, seq=8, hidden=32 (goes through the XLA fallback).
    batch, seq, hidden = 2, 8, 32
    x = jax.random.normal(k_x, (batch, seq, hidden), jnp.float32)
    inner = LinearModule(hidden, hidden, k_m)
    model = DummyDataParallel(inner)

    y = model(x)
    jax.block_until_ready(y)
    y_ref = x @ inner.weight.T + inner.bias
    assert y.shape == (batch, seq, hidden)
    assert jnp.allclose(y, y_ref, atol=1e-5, rtol=1e-5)

    # Same small shape forced through the Pallas kernel (padding path).
    y_p = model(x, force_pallas=True)
    jax.block_until_ready(y_p)
    assert jnp.allclose(y_p, y_ref, atol=2e-2, rtol=2e-2)

    # Larger shape: single-K-step Pallas path with bf16 operands.
    k_x2, k_m2 = jax.random.split(k_x)
    x_big = jax.random.normal(k_x2, (4, 96, 384), jnp.float32)
    inner_big = LinearModule(384, 640, k_m2)
    y_big = DummyDataParallel(inner_big)(x_big)
    jax.block_until_ready(y_big)
    y_big_ref = x_big @ inner_big.weight.T + inner_big.bias
    assert y_big.shape == (4, 96, 640)
    assert jnp.allclose(y_big, y_big_ref, atol=2e-2, rtol=2e-2)

    # Deep-K shape: exercises the multi-K-step accumulator path (K > 512).
    k_x3, k_m3 = jax.random.split(k_x2)
    x_deep = jax.random.normal(k_x3, (2, 64, 1024), jnp.float32)
    inner_deep = LinearModule(1024, 256, k_m3)
    y_deep = DummyDataParallel(inner_deep)(x_deep)
    jax.block_until_ready(y_deep)
    y_deep_ref = x_deep @ inner_deep.weight.T + inner_deep.bias
    assert y_deep.shape == (2, 64, 256)
    assert jnp.allclose(y_deep, y_deep_ref, atol=2e-2, rtol=2e-2)

    print("KERNEL_OK")
</pallas_src>

<mosaic_0001>
module attributes {stable_mosaic.version = 11 : i64} {
  func.func @_linear_kernel_single(%arg0: i32, %arg1: i32, %arg2: memref<16x128xbf16, #tpu.memory_space<vmem>>, %arg3: memref<128x128xbf16, #tpu.memory_space<vmem>>, %arg4: memref<1x128xf32, #tpu.memory_space<vmem>>, %arg5: memref<16x128xf32, #tpu.memory_space<vmem>>) attributes {dimension_semantics = [#tpu.dimension_semantics<parallel>, #tpu.dimension_semantics<parallel>], iteration_bounds = array<i64: 1, 1>, scalar_prefetch = 0 : i64, scratch_operands = 0 : i64, tpu.core_type = #tpu.core_type<tc>, window_params = [{transform_indices = @transform_0, window_bounds = array<i64: 16, 128>}, {transform_indices = @transform_1, window_bounds = array<i64: 128, 128>}, {transform_indices = @transform_2, window_bounds = array<i64: 1, 128>}, {transform_indices = @transform_3, window_bounds = array<i64: 16, 128>}]} {
    %c0 = arith.constant 0 : index
    %c0_0 = arith.constant 0 : index
    %0 = vector.load %arg2[%c0, %c0_0] : memref<16x128xbf16, #tpu.memory_space<vmem>>, vector<16x128xbf16>
    %c0_1 = arith.constant 0 : index
    %c0_2 = arith.constant 0 : index
    %1 = vector.load %arg3[%c0_1, %c0_2] : memref<128x128xbf16, #tpu.memory_space<vmem>>, vector<128x128xbf16>
    %cst = arith.constant dense<0.000000e+00> : vector<16x128xf32>
    %2 = tpu.matmul %0, %1, %cst {dimension_numbers = #tpu.dot_dimension_numbers<[1], [0], [0], [1], [0, 0, 1, 1], [], []>} : vector<16x128xbf16>, vector<128x128xbf16>, vector<16x128xf32> -> vector<16x128xf32>
    %c0_3 = arith.constant 0 : index
    %c0_4 = arith.constant 0 : index
    %3 = vector.load %arg4[%c0_3, %c0_4] : memref<1x128xf32, #tpu.memory_space<vmem>>, vector<1x128xf32>
    %4 = vector.broadcast %3 : vector<1x128xf32> to vector<16x128xf32>
    %5 = arith.addf %2, %4 : vector<16x128xf32>
    %c0_5 = arith.constant 0 : index
    %c0_6 = arith.constant 0 : index
    %6 = vector.load %arg5[%c0_5, %c0_6] : memref<16x128xf32, #tpu.memory_space<vmem>>, vector<16x128xf32>
    tpu.vector_store %arg5[%c0_5, %c0_6], %5 {strides = array<i32>} : memref<16x128xf32, #tpu.memory_space<vmem>>, vector<16x128xf32>,
    return
  }
  func.func @transform_0(%arg0: i32, %arg1: i32) -> (i32, i32) {
    %c0_i32 = arith.constant 0 : i32
    %c0_i32_0 = arith.constant 0 : i32
    return %arg0, %c0_i32 : i32, i32
  }
  func.func @transform_1(%arg0: i32, %arg1: i32) -> (i32, i32) {
    %c0_i32 = arith.constant 0 : i32
    %c0_i32_0 = arith.constant 0 : i32
    return %c0_i32, %arg1 : i32, i32
  }
  func.func @transform_2(%arg0: i32, %arg1: i32) -> (i32, i32) {
    %c0_i32 = arith.constant 0 : i32
    %c0_i32_0 = arith.constant 0 : i32
    return %c0_i32, %arg1 : i32, i32
  }
  func.func @transform_3(%arg0: i32, %arg1: i32) -> (i32, i32) {
    %c0_i32 = arith.constant 0 : i32
    return %arg0, %arg1 : i32, i32
  }
}

</mosaic_0001>

<bundles_post_ra>
// kernel: tpu_custom_call.1
= control target key start
LH: loop header
LB: loop body
LE: loop exit
PB: predicated region body
PF: predicated region fallthrough
CT: control target
= control target key end

     0   :  { %8 = vsyncpa [#allocation3], 0  ;;  %s381_s0 = inlined_call_operand.hbm [shape: bf16[16,128], index: 0, kind: input, shape index: {}]   ;;  %s382_s1 = inlined_call_operand.hbm [shape: bf16[128,128], index: 1, kind: input, shape index: {}]   ;;  %s383_s2 = inlined_call_operand.vmem [shape: f32[1,128], index: 2, kind: input, shape index: {}]   ;;  %s384_s3 = inlined_call_operand.hbm [shape: f32[16,128], index: 3, kind: output, shape index: {}]  }
   0x1   :  { %9 = vsyncpa [#allocation6], 0 }
   0x2   :  { %10 = vsyncpa [#allocation4], 0  ;;  %s313_s12 = smov [#allocation2]   ;;  %s241_s16 = scalar_lea.hbm %s381_s0, 128 }
   0x3   :  { %s16_s13 = sshll.u32 %s313_s12, 4  ;;  %p242_p0 = scmp.ne.s32.totalorder %s381_s0, %s241_s16  ;;  %s17_s13 = int_to_ptr.vmem [resolvable:$true] %s16_s13 }
   0x4   :  { %p245_p1 = scmp.lt.u32.totalorder %s241_s16, %s381_s0 }
   0x6   :  { %p247_p2 = pnand %p245_p1, %p242_p0 }
   0x8   :  { %250 = shalt.err (!%p247_p2)
}
   0x9   :  { %s251_s21 = scalar_lea.vmem %s17_s13, 128  ;;  %p256_p4 = scmp.lt.s32.totalorder %s17_s13, %s17_s13 }
   0xa   :  { %p252_p3 = scmp.ne.s32.totalorder %s17_s13, %s251_s21  ;;  %p257_p5 = scmp.lt.s32.totalorder %s251_s21, %s251_s21 }
   0xc   :  { %p258_p6 = por %p257_p5, %p256_p4 }
   0xe   :  { %p259_p7 = pnand %p258_p6, %p252_p3 }
  0x10   :  { %262 = shalt.err (!%p259_p7)
}
  0x11   :  { %s314_s22 = smov 64   ;;  %s315_s23 = smov 4  }
  0x12   :  { %22 = dma.hbm_to_vmem [thread:$0]  %s381_s0, 128, %s17_s13, [#allocation3], %s314_s22, %s314_s22, %s315_s23  }
  0x13   :  { %s316_s26 = smov [#allocation5]   ;;  %s263_s30 = scalar_lea.hbm %s382_s1, 1024 }
  0x14   :  { %s28_s27 = sshll.u32 %s316_s26, 4  ;;  %p264_p8 = scmp.ne.s32.totalorder %s382_s1, %s263_s30  ;;  %s29_s27 = int_to_ptr.vmem [resolvable:$true] %s28_s27 }
  0x15   :  { %p267_p9 = scmp.lt.u32.totalorder %s263_s30, %s382_s1 }
  0x17   :  { %p269_p10 = pnand %p267_p9, %p264_p8 }
  0x19   :  { %272 = shalt.err (!%p269_p10)
}
  0x1a   :  { %s273_s8 = scalar_lea.vmem %s29_s27, 1024  ;;  %p278_p12 = scmp.lt.s32.totalorder %s29_s27, %s29_s27 }
  0x1b   :  { %p274_p11 = scmp.ne.s32.totalorder %s29_s27, %s273_s8  ;;  %p279_p13 = scmp.lt.s32.totalorder %s273_s8, %s273_s8 }
  0x1d   :  { %p280_p0 = por %p279_p13, %p278_p12 }
  0x1f   :  { %p281_p1 = pnand %p280_p0, %p274_p11 }
  0x21   :  { %284 = shalt.err (!%p281_p1)
}
  0x22   :  { %34 = dma.hbm_to_vmem [thread:$0]  %s382_s1, 1024, %s29_s27, [#allocation6], %s314_s22, %s314_s22, %s315_s23  }
  0x23   :  { %307 = dma.done.wait [#allocation3], 128  }
  0x24   :  { %308 = vsyncadd [#allocation3], 4294967168 }
  0x25   :  { %309 = dma.done.wait [#allocation6], 1024  }
  0x26   :  { %310 = vsyncadd [#allocation6], 4294966272  ;;  %v317_v0 = vmov 0.0   ;;  %vm318_vm0 = vmmov 0   ;;  %v232_v1 = vld [vmem:[#allocation5] sm:$0xff]   ;;  %v233_v2 = vld [vmem:[#allocation5 + $0x8] sm:$0xff]  }
  0x27   :  { %203 = vmatprep.subr.bf16.mxu0 %v317_v0  ;;  %219 = vmatprep.mubr.msk.bf16.mxu0 %vm318_vm0, %v317_v0  ;;  %v234_v3 = vld [vmem:[#allocation5 + $0x10] sm:$0xff]   ;;  %v235_v4 = vld [vmem:[#allocation5 + $0x18] sm:$0xff]   ;;  %v236_v5 = vld [vmem:[#allocation5 + $0x20] sm:$0xff]   ;;  %s319_s11 = smov [#allocation7]  }
  0x28   :  { %204 = vmatpush3.bf16.msra.mxu0 %v232_v1  ;;  %v237_v6 = vld [vmem:[#allocation5 + $0x28] sm:$0xff]   ;;  %v238_v7 = vld [vmem:[#allocation5 + $0x30] sm:$0xff]   ;;  %v239_v8 = vld [vmem:[#allocation5 + $0x38] sm:$0xff]   ;;  %s171_s12 = sshll.u32 %s319_s11, 4  ;;  %s172_s12 = int_to_ptr.vmem [resolvable:$true] %s171_s12 }
  0x29   :  { %205 = vmatprep.subr.bf16.mxu0 %v317_v0  ;;  %v240_v9 = vld [vmem:[#allocation2] sm:$0xff]   ;;  %s285_s13 = scalar_lea.vmem %s172_s12, 256  ;;  %p290_p3 = scmp.lt.s32.totalorder %s172_s12, %s172_s12 }
  0x2a   :  { %v184_v10 = vld [vmem:[%s383_s2] ss:$0 sm:$0xff]  ;;  %p286_p2 = scmp.ne.s32.totalorder %s172_s12, %s285_s13  ;;  %p291_p4 = scmp.lt.s32.totalorder %s285_s13, %s285_s13 }
  0x2c   :  { %206 = vmatpush3.bf16.msra.mxu0 %v233_v2  ;;  %p292_p5 = por %p291_p4, %p290_p3 }
  0x2d   :  { %207 = vmatprep.subr.bf16.mxu0 %v317_v0 }
  0x2e   :  { %p293_p6 = pnand %p292_p5, %p286_p2 }
  0x30   :  { %208 = vmatpush3.bf16.msra.mxu0 %v234_v3 }
  0x31   :  { %209 = vmatprep.subr.bf16.mxu0 %v317_v0 }
  0x34   :  { %210 = vmatpush3.bf16.msra.mxu0 %v235_v4 }
  0x35   :  { %211 = vmatprep.subr.bf16.mxu0 %v317_v0 }
  0x38   :  { %212 = vmatpush3.bf16.msra.mxu0 %v236_v5 }
  0x39   :  { %213 = vmatprep.subr.bf16.mxu0 %v317_v0 }
  0x3c   :  { %214 = vmatpush3.bf16.msra.mxu0 %v237_v6 }
  0x3d   :  { %215 = vmatprep.subr.bf16.mxu0 %v317_v0 }
  0x40   :  { %216 = vmatpush3.bf16.msra.mxu0 %v238_v7 }
  0x41   :  { %217 = vmatprep.subr.bf16.mxu0 %v317_v0 }
  0x44   :  { %218 = vmatpush3.bf16.msra.mxu0 %v239_v8 }
  0x47   :  { %220 = vmatmul.mubr.bf16.vlgmr.msra.gmra.mrb[0].mxu0 %v240_v9 }
 0x11a   :  { %v157_v11 = vpop.f32.mrb[0].mxu0 }
 0x11b   :  { %v158_v12 = vadd.f32 %v184_v10, %v157_v11  ;;  %v221_v13 = vpop.f32.mrb[1].mxu0 }
 0x11c   :  { %v160_v14 = vpop.f32.mrb[2].mxu0 }
 0x11d   :  { %164 = vst [vmem:[#allocation7] sm:$0xff] %v158_v12  ;;  %v161_v15 = vadd.f32 %v184_v10, %v160_v14  ;;  %v222_v16 = vpop.f32.mrb[3].mxu0 }
 0x11f   :  { %165 = vst [vmem:[#allocation7 + $0x8] sm:$0xff] %v161_v15 }
 0x120   :  { %296 = shalt.err (!%p293_p6)
}
 0x121   :  { %s297_s15 = scalar_lea.hbm %s384_s3, 256 }
 0x122   :  { %p298_p7 = scmp.ne.s32.totalorder %s384_s3, %s297_s15  ;;  %p301_p8 = scmp.lt.u32.totalorder %s297_s15, %s384_s3 }
 0x124   :  { %p303_p9 = pnand %p301_p8, %p298_p7 }
 0x126   :  { %306 = shalt.err (!%p303_p9)
}
 0x127   :  { %s320_s20 = smov 128   ;;  %s321_s21 = smov 8  }
 0x128   :  { %177 = dma.vmem_to_hbm [thread:$0]  %s172_s12, 256, %s384_s3, [#allocation4], %s320_s20, %s320_s20, %s321_s21  }
 0x129   :  { %311 = dma.done.wait [#allocation4], 256  }
 0x12a   :  { %312 = vsyncadd [#allocation4], 4294967040 }
 0x12b   :  { %181 = vsyncpa [#allocation3], 1 }
 0x12c   :  { %182 = vsyncpa [#allocation6], 1 }
 0x12d   :  { %183 = vsyncpa [#allocation4], 1 }

</bundles_post_ra>
